<compile_context>
chip_gen: v5e
topology: v5e:2x2
jax: 0.10.0
libtpu: 0.0.40
codegen_flags: <defaults>
</compile_context>

<pallas_src>
import functools
import math

import jax
import jax.numpy as jnp
from jax.experimental import pallas as pl
from jax.experimental.pallas import tpu as pltpu


def _round_up(a, b):
    return (a + b - 1) // b * b


def _cdiv(a, b):
    return (a + b - 1) // b


def _vmem_capacity_bytes():
    """Physical VMEM per TensorCore, with a conservative fallback."""
    try:
        info = pltpu.get_tpu_info()
        for attr in ("vmem_capacity_bytes", "vmem_size_bytes", "vmem_bytes"):
            val = getattr(info, attr, None)
            if val:
                return int(val)
    except Exception:
        pass
    return 64 * 1024 * 1024   # v7x per-TC VMEM (smallest of v5e/v6e/v7x)


def _classifier_kernel(x_ref, wt_ref, b_ref, o_ref, acc_ref, *, tail_rows):
    # x_ref:  (TB, TL, C_f)   streamed sequence chunk (lane-dense, input dtype)
    # wt_ref: (C_f, C_out) f32 = tile(W^T, (k,1)) / L   (fold-undo + mean baked in)
    # b_ref:  (1, C_out)  f32
    # o_ref:  (TB, C_out)     resident across the L grid axis
    # acc_ref:(TB, C_f)   f32 running raw sum over the sequence
    l = pl.program_id(1)
    last = pl.num_programs(1) - 1

    @pl.when(l == 0)
    def _init():
        acc_ref[...] = jnp.zeros_like(acc_ref)

    def _accumulate(xt):
        # f32 accumulation without materializing a full f32 copy of the tile.
        acc_ref[...] += jnp.sum(xt, axis=1, dtype=jnp.float32)

    if tail_rows == x_ref.shape[1]:
        # L_f divides evenly into chunks: single fast path, no masking at all.
        _accumulate(x_ref[...])
    else:
        @pl.when(l != last)
        def _full_chunk():
            _accumulate(x_ref[...])

        @pl.when(l == last)
        def _ragged_tail():
            xt = x_ref[...]
            rows = jax.lax.broadcasted_iota(jnp.int32, xt.shape, 1)
            _accumulate(jnp.where(rows < tail_rows, xt, jnp.zeros_like(xt)))

    @pl.when(l == last)
    def _finalize():
        # Mean + Linear: the 1/L scale and lane-fold undo live in wt_ref.
        logits = jnp.dot(acc_ref[...], wt_ref[...],
                         preferred_element_type=jnp.float32)
        logits = logits + b_ref[...]
        # Softmax over the class dimension.
        m = jnp.max(logits, axis=-1, keepdims=True)
        e = jnp.exp(logits - m)
        probs = e * pl.reciprocal(jnp.sum(e, axis=-1, keepdims=True),
                                  approx=False)
        o_ref[...] = probs.astype(o_ref.dtype)


def classifier_forward(x, weight, bias, *, tb=None, tl_cap=None,
                       tile_budget_bytes=None, vmem_limit_bytes=None):
    """Mean-pool over L + Linear + Softmax.

    x: (B, L, C_in) float (bf16 recommended for the big stream);
    weight: (C_out, C_in) [PyTorch layout]; bias: (C_out,).
    Returns (B, 1, C_out) float32.
    """
    B, L, C_in = x.shape
    C_out = weight.shape[0]

    # --- Lane-density fold: fold k consecutive sequence rows into the channel
    # --- axis so the streamed minor dim is a multiple of 128 lanes. This is a
    # --- metadata-only reshape of a contiguous array -> no HBM copy.
    k = 128 // math.gcd(C_in, 128)
    if k > 1 and L % k != 0:
        # TODO(synk): handle L % k != 0 without a pad copy (separate tail
        # fixup); fall back to the unfolded (lane-sparse) stream for now.
        k = 1
    C_f = k * C_in
    L_f = L // k
    x_f = x.reshape(B, L_f, C_f) if k > 1 else x

    # --- Batch tile: multiple of 8 sublanes, sized so the batch grid axis has
    # --- >= 2 tiles whenever B > 1 ("parallel" axis feeds both v7x TCs).
    if tb is None:
        tb = min(64, _round_up(_cdiv(B, 2), 8))
    tb = max(8, _round_up(tb, 8))
    grid_b = _cdiv(B, tb)
    # TODO(synk): for B <= 8 the batch axis has one tile; splitting the L
    # reduction across cores (per-core partials + combine) would keep both
    # v7x TensorCores busy for tiny-batch inference.

    # --- Sequence tile sized against a per-buffer VMEM budget (double-buffered
    # --- by the pipeline); budget derived from this chip's VMEM capacity.
    vmem_cap = _vmem_capacity_bytes()
    if tile_budget_bytes is None:
        tile_budget_bytes = max(4 << 20, min(16 << 20, vmem_cap // 6))
    itemsize = jnp.dtype(x_f.dtype).itemsize
    tl = tile_budget_bytes // max(1, tb * C_f * itemsize)
    tl = max(8, (tl // 8) * 8)
    if tl_cap is not None:
        tl = max(8, min(tl, _round_up(tl_cap, 8)))
    tl = min(tl, _round_up(L_f, 8))
    grid_l = _cdiv(L_f, tl)
    tail_rows = L_f - (grid_l - 1) * tl          # valid rows of the last chunk

    if vmem_limit_bytes is None:
        x_tile_bytes = tb * tl * C_f * itemsize
        vmem_limit_bytes = max(32 << 20,
                               min(vmem_cap * 3 // 4,
                                   2 * x_tile_bytes + (16 << 20)))

    # Fold-undo + 1/L mean baked into the (pre-transposed) weight:
    # acc[:, j*C_in:(j+1)*C_in] holds the raw sum of fold slot j, so
    # acc @ tile(W^T, (k, 1)) / L == mean_pool(x) @ W^T.
    wt_rep = jnp.tile(jnp.asarray(weight, jnp.float32).T, (k, 1)) / float(L)
    bias2d = jnp.asarray(bias, jnp.float32).reshape(1, C_out)

    kernel = functools.partial(_classifier_kernel, tail_rows=int(tail_rows))

    out = pl.pallas_call(
        kernel,
        out_shape=jax.ShapeDtypeStruct((B, C_out), jnp.float32),
        grid_spec=pltpu.PrefetchScalarGridSpec(
            num_scalar_prefetch=0,
            grid=(grid_b, grid_l),
            in_specs=[
                pl.BlockSpec((tb, tl, C_f), lambda b, l: (b, l, 0)),
                pl.BlockSpec((C_f, C_out), lambda b, l: (0, 0)),
                pl.BlockSpec((1, C_out), lambda b, l: (0, 0)),
            ],
            out_specs=pl.BlockSpec((tb, C_out), lambda b, l: (b, 0)),
            scratch_shapes=[pltpu.VMEM((tb, C_f), jnp.float32)],
        ),
        compiler_params=pltpu.CompilerParams(
            # Batch axis shards across TensorCores (v7x); L is the reduction.
            dimension_semantics=("parallel", "arbitrary"),
            vmem_limit_bytes=int(vmem_limit_bytes),
        ),
    )(x_f, wt_rep, bias2d)

    # (B, C_out) -> (B, 1, C_out) to match the PyTorch module output.
    return out.reshape(B, 1, C_out)


if __name__ == "__main__":
    # Small shapes consistent with the module (scaled-down c_in). They exercise
    # the ragged batch tile (B=10 vs tb=8), multi-step L accumulation with a
    # ragged tail (L_f=25 vs tl=8), and the lane-density fold (C_in=32 -> k=4).
    B, L, C_IN, C_OUT = 10, 100, 32, 2

    key = jax.random.PRNGKey(0)
    kx, kw, kb = jax.random.split(key, 3)

    x_f32 = jax.random.normal(kx, (B, L, C_IN), dtype=jnp.float32)
    # PyTorch Linear default init: uniform(-k, k), k = 1/sqrt(c_in).
    kinit = 1.0 / jnp.sqrt(jnp.float32(C_IN))
    weight = jax.random.uniform(kw, (C_OUT, C_IN), minval=-kinit, maxval=kinit,
                                dtype=jnp.float32)
    bias = jax.random.uniform(kb, (C_OUT,), minval=-kinit, maxval=kinit,
                              dtype=jnp.float32)

    # Stream x as bf16 (halves HBM traffic of the only large tensor); the
    # kernel accumulates in f32.
    x = x_f32.astype(jnp.bfloat16)

    # tl_cap=8 forces several L grid steps (with a ragged tail) even at this
    # small size, so the accumulate / tail-mask / finalize path really runs.
    fwd = jax.jit(functools.partial(classifier_forward, tl_cap=8))
    y = jax.block_until_ready(fwd(x, weight, bias))

    # Reference in plain JAX on the same bf16-rounded inputs.
    x_ref = x.astype(jnp.float32)
    pooled_ref = jnp.mean(x_ref, axis=1, keepdims=True)       # (B, 1, C_in)
    logits_ref = pooled_ref @ weight.T + bias                  # (B, 1, C_out)
    y_ref = jax.nn.softmax(logits_ref, axis=2)

    assert y.shape == (B, 1, C_OUT)
    assert bool(jnp.all(jnp.isfinite(y)))
    assert jnp.allclose(y, y_ref, atol=1e-4, rtol=1e-4), (
        float(jnp.max(jnp.abs(y - y_ref))))

    print("KERNEL_OK")
</pallas_src>

<mosaic_0001>
module attributes {stable_mosaic.version = 11 : i64} {
  func.func @_classifier_kernel(%arg0: i32, %arg1: i32, %arg2: memref<8x8x128xbf16, #tpu.memory_space<vmem>>, %arg3: memref<128x2xf32, #tpu.memory_space<vmem>>, %arg4: memref<1x2xf32, #tpu.memory_space<vmem>>, %arg5: memref<8x2xf32, #tpu.memory_space<vmem>>, %arg6: memref<8x128xf32, #tpu.memory_space<vmem>>) attributes {dimension_semantics = [#tpu.dimension_semantics<parallel>, #tpu.dimension_semantics<arbitrary>], iteration_bounds = array<i64: 2, 4>, scalar_prefetch = 0 : i64, scratch_operands = 1 : i64, tpu.core_type = #tpu.core_type<tc>, window_params = [{transform_indices = @transform_0, window_bounds = array<i64: 8, 8, 128>}, {pipeline_mode = #tpu.pipeline_mode<synchronous>, transform_indices = @transform_1, window_bounds = array<i64: 128, 2>}, {pipeline_mode = #tpu.pipeline_mode<synchronous>, transform_indices = @transform_2, window_bounds = array<i64: 1, 2>}, {transform_indices = @transform_3, window_bounds = array<i64: 8, 2>}]} {
    %c0_i32 = arith.constant 0 : i32
    %0 = arith.cmpi eq, %arg1, %c0_i32 : i32
    %1 = arith.extui %0 : i1 to i32
    %c0_i32_0 = arith.constant 0 : i32
    %2 = arith.cmpi ne, %1, %c0_i32_0 : i32
    scf.if %2 {
      %cst = arith.constant 0.000000e+00 : f32
      %12 = vector.broadcast %cst : f32 to vector<8x128xf32>
      %c0 = arith.constant 0 : index
      %c0_6 = arith.constant 0 : index
      %13 = vector.load %arg6[%c0, %c0_6] : memref<8x128xf32, #tpu.memory_space<vmem>>, vector<8x128xf32>
      tpu.vector_store %arg6[%c0, %c0_6], %12 {strides = array<i32>} : memref<8x128xf32, #tpu.memory_space<vmem>>, vector<8x128xf32>,
    } else {
    }
    %c3_i32 = arith.constant 3 : i32
    %3 = arith.cmpi ne, %arg1, %c3_i32 : i32
    %4 = arith.extui %3 : i1 to i32
    %c0_i32_1 = arith.constant 0 : i32
    %5 = arith.cmpi ne, %4, %c0_i32_1 : i32
    scf.if %5 {
      %c0 = arith.constant 0 : index
      %c0_6 = arith.constant 0 : index
      %c0_7 = arith.constant 0 : index
      %12 = vector.load %arg2[%c0, %c0_6, %c0_7] : memref<8x8x128xbf16, #tpu.memory_space<vmem>>, vector<8x8x128xbf16>
      %c0_8 = arith.constant 0 : index
      %c0_9 = arith.constant 0 : index
      %13 = vector.load %arg6[%c0_8, %c0_9] : memref<8x128xf32, #tpu.memory_space<vmem>>, vector<8x128xf32>
      %14 = arith.extf %12 : vector<8x8x128xbf16> to vector<8x8x128xf32>
      %cst = arith.constant dense<0.000000e+00> : vector<8x128xf32>
      %15 = vector.multi_reduction <add>, %14, %cst [1] : vector<8x8x128xf32> to vector<8x128xf32>
      %16 = arith.addf %13, %15 : vector<8x128xf32>
      %c0_10 = arith.constant 0 : index
      %c0_11 = arith.constant 0 : index
      %17 = vector.load %arg6[%c0_10, %c0_11] : memref<8x128xf32, #tpu.memory_space<vmem>>, vector<8x128xf32>
      tpu.vector_store %arg6[%c0_10, %c0_11], %16 {strides = array<i32>} : memref<8x128xf32, #tpu.memory_space<vmem>>, vector<8x128xf32>,
    } else {
    }
    %c3_i32_2 = arith.constant 3 : i32
    %6 = arith.cmpi eq, %arg1, %c3_i32_2 : i32
    %7 = arith.extui %6 : i1 to i32
    %c0_i32_3 = arith.constant 0 : i32
    %8 = arith.cmpi ne, %7, %c0_i32_3 : i32
    scf.if %8 {
      %c0 = arith.constant 0 : index
      %c0_6 = arith.constant 0 : index
      %c0_7 = arith.constant 0 : index
      %12 = vector.load %arg2[%c0, %c0_6, %c0_7] : memref<8x8x128xbf16, #tpu.memory_space<vmem>>, vector<8x8x128xbf16>
      %13 = tpu.iota {dimensions = array<i32: 1>} : vector<8x8x128xi32>
      %c1_i32 = arith.constant 1 : i32
      %14 = vector.broadcast %c1_i32 : i32 to vector<8x8x128xi32>
      %15 = arith.cmpi slt, %13, %14 : vector<8x8x128xi32>
      %cst = arith.constant 0.000000e+00 : bf16
      %16 = vector.broadcast %cst : bf16 to vector<8x8x128xbf16>
      %17 = arith.select %15, %12, %16 : vector<8x8x128xi1>, vector<8x8x128xbf16>
      %c0_8 = arith.constant 0 : index
      %c0_9 = arith.constant 0 : index
      %18 = vector.load %arg6[%c0_8, %c0_9] : memref<8x128xf32, #tpu.memory_space<vmem>>, vector<8x128xf32>
      %19 = arith.extf %17 : vector<8x8x128xbf16> to vector<8x8x128xf32>
      %cst_10 = arith.constant dense<0.000000e+00> : vector<8x128xf32>
      %20 = vector.multi_reduction <add>, %19, %cst_10 [1] : vector<8x8x128xf32> to vector<8x128xf32>
      %21 = arith.addf %18, %20 : vector<8x128xf32>
      %c0_11 = arith.constant 0 : index
      %c0_12 = arith.constant 0 : index
      %22 = vector.load %arg6[%c0_11, %c0_12] : memref<8x128xf32, #tpu.memory_space<vmem>>, vector<8x128xf32>
      tpu.vector_store %arg6[%c0_11, %c0_12], %21 {strides = array<i32>} : memref<8x128xf32, #tpu.memory_space<vmem>>, vector<8x128xf32>,
    } else {
    }
    %c3_i32_4 = arith.constant 3 : i32
    %9 = arith.cmpi eq, %arg1, %c3_i32_4 : i32
    %10 = arith.extui %9 : i1 to i32
    %c0_i32_5 = arith.constant 0 : i32
    %11 = arith.cmpi ne, %10, %c0_i32_5 : i32
    scf.if %11 {
      %c0 = arith.constant 0 : index
      %c0_6 = arith.constant 0 : index
      %12 = vector.load %arg6[%c0, %c0_6] : memref<8x128xf32, #tpu.memory_space<vmem>>, vector<8x128xf32>
      %c0_7 = arith.constant 0 : index
      %c0_8 = arith.constant 0 : index
      %13 = vector.load %arg3[%c0_7, %c0_8] : memref<128x2xf32, #tpu.memory_space<vmem>>, vector<128x2xf32>
      %cst = arith.constant dense<0.000000e+00> : vector<8x2xf32>
      %14 = tpu.matmul %12, %13, %cst {dimension_numbers = #tpu.dot_dimension_numbers<[1], [0], [0], [1], [0, 0, 1, 1], [], []>} : vector<8x128xf32>, vector<128x2xf32>, vector<8x2xf32> -> vector<8x2xf32>
      %c0_9 = arith.constant 0 : index
      %c0_10 = arith.constant 0 : index
      %15 = vector.load %arg4[%c0_9, %c0_10] : memref<1x2xf32, #tpu.memory_space<vmem>>, vector<1x2xf32>
      %16 = vector.broadcast %15 : vector<1x2xf32> to vector<8x2xf32>
      %17 = arith.addf %14, %16 : vector<8x2xf32>
      %cst_11 = arith.constant dense<0xFF800000> : vector<8xf32>
      %18 = vector.multi_reduction <maximumf>, %17, %cst_11 [1] : vector<8x2xf32> to vector<8xf32>
      %19 = vector.shape_cast %18 : vector<8xf32> to vector<8x1xf32>
      %20 = vector.broadcast %19 : vector<8x1xf32> to vector<8x2xf32>
      %21 = arith.subf %17, %20 : vector<8x2xf32>
      %22 = math.exp %21 : vector<8x2xf32>
      %cst_12 = arith.constant dense<0.000000e+00> : vector<8xf32>
      %23 = vector.multi_reduction <add>, %22, %cst_12 [1] : vector<8x2xf32> to vector<8xf32>
      %24 = vector.shape_cast %23 : vector<8xf32> to vector<8x1xf32>
      %25 = tpu.reciprocal %24 : vector<8x1xf32> -> vector<8x1xf32>
      %26 = vector.broadcast %25 : vector<8x1xf32> to vector<8x2xf32>
      %27 = arith.mulf %22, %26 : vector<8x2xf32>
      %c0_13 = arith.constant 0 : index
      %c0_14 = arith.constant 0 : index
      %28 = vector.load %arg5[%c0_13, %c0_14] : memref<8x2xf32, #tpu.memory_space<vmem>>, vector<8x2xf32>
      tpu.vector_store %arg5[%c0_13, %c0_14], %27 {strides = array<i32>} : memref<8x2xf32, #tpu.memory_space<vmem>>, vector<8x2xf32>,
    } else {
    }
    return
  }
  func.func @transform_0(%arg0: i32, %arg1: i32) -> (i32, i32, i32) {
    %c0_i32 = arith.constant 0 : i32
    %c0_i32_0 = arith.constant 0 : i32
    return %arg0, %arg1, %c0_i32 : i32, i32, i32
  }
  func.func @transform_1(%arg0: i32, %arg1: i32) -> (i32, i32) {
    %c0_i32 = arith.constant 0 : i32
    %c0_i32_0 = arith.constant 0 : i32
    %c0_i32_1 = arith.constant 0 : i32
    return %c0_i32, %c0_i32_0 : i32, i32
  }
  func.func @transform_2(%arg0: i32, %arg1: i32) -> (i32, i32) {
    %c0_i32 = arith.constant 0 : i32
    %c0_i32_0 = arith.constant 0 : i32
    %c0_i32_1 = arith.constant 0 : i32
    return %c0_i32, %c0_i32_0 : i32, i32
  }
  func.func @transform_3(%arg0: i32, %arg1: i32) -> (i32, i32) {
    %c0_i32 = arith.constant 0 : i32
    %c0_i32_0 = arith.constant 0 : i32
    return %arg0, %c0_i32 : i32, i32
  }
}

</mosaic_0001>

<bundles_post_ra>
// kernel: classifier_forward.1
= control target key start
LH: loop header
LB: loop body
LE: loop exit
PB: predicated region body
PF: predicated region fallthrough
CT: control target
= control target key end

     0   :  { %s1038_s12 = smov 0   ;;  %s1040_s13 = smov 0   ;;  %s1280_s0 = inlined_call_operand.vmem [shape: bf16[10,25,128], index: 0, kind: input, shape index: {}]   ;;  %s1281_s1 = inlined_call_operand.vmem [shape: f32[128,2], index: 1, kind: input, shape index: {}]   ;;  %s1282_s2 = inlined_call_operand.vmem [shape: f32[1,2], index: 2, kind: input, shape index: {}]   ;;  %s1283_s3 = inlined_call_operand.vmem [shape: f32[10,2], index: 3, kind: output, shape index: {}]  }
   0x1   :  { %s1042_s14 = smov 0   ;;  %s1044_s15 = smov 0  }
   0x2   :  { %s1046_s16 = smov 0   ;;  %s1048_s17 = smov 0  }
   0x3   :  { %s1050_s18 = smov 0  }
   0x4 LB: > { %s22_s19 = sadd.s32 1, %s975_s16  ;;  %s25_s20 = sadd.s32 1, %s979_s17  ;;  %s983_s18 = sphi %s1050_s18, %s13_s18   ;;  %s979_s17 = sphi %s1048_s17, %s1295_s17   ;;  %s975_s16 = sphi %s1046_s16, %s1294_s16   ;;  %s971_s15 = sphi %s1044_s15, %s1293_s15   ;;  %s967_s14 = sphi %s1042_s14, %s1292_s14   ;;  %s963_s13 = sphi %s1040_s13, %s1291_s13   ;;  %s959_s12 = sphi %s1038_s12, %s1290_s12  }
   0x5   : > { %p23_p0 = scmp.ge.s32.totalorder %s22_s19, 4  ;;  %p41_p1 = scmp.ne.s32.totalorder %s963_s13, %s959_s12 }
   0x6   : > { %p42_p2 = scmp.eq.s32.totalorder %s983_s18, 0  ;;  %s34_s24 = sadd.s32 1, %s963_s13 }
   0x7   : > { %s1297_s19 = smov (%p23_p0, %s22_s19), 0  ;;  %s1299_s20 = smov (!%p23_p0, %s25_s20), %s979_s17 }
   0x8   : > { %p43_p3 = por %p42_p2, %p41_p1  ;;  %p27_p4 = scmp.ge.s32.totalorder %s1299_s20, 2 }
   0x9   : > { %s30_s21 = ssub.s32 %s975_s16, %s1297_s19  ;;  %p724_p6 = scmp.ge.s32.totalorder %s983_s18, 8 }
   0xa   : > { %s1301_s20 = smov (%p27_p4, %s1299_s20), 0 }
   0xb   : > { %s29_s22 = ssub.s32 %s979_s17, %s1301_s20  ;;  %141 = sbr.rel (%p724_p6) target bundleno = 63 (0x3f), region = 24 }
   0xc   : > { %s31_s23 = sor.u32 %s30_s21, %s29_s22 }
   0xd   : > { %p32_p5 = scmp.eq.s32.totalorder %s31_s23, 0 }
   0xf   : > { %s1089_s25 = scalar_select %p32_p5, %s963_s13, %s34_s24  }
  0x10   : > { %144 = sbr.rel (!%p43_p3) target bundleno = 63 (0x3f), region = 28  ;;  %s146_s26 = sand.u32 (%p43_p3), 1, %s963_s13  }
  0x11   : > { %s726_s27 = sshll.u32 (%p43_p3), %s979_s17, 3  ;;  %s725_s28 = sshll.u32 (%p43_p3), %s146_s26, 5 }
  0x12   : > { %s150_s29 = ssub.s32 (%p43_p3), 10, %s726_s27  ;;  %s749_s30 = sshll.u32 (%p43_p3), %s979_s17, 5 }
  0x13   : > { %p151_p7 = scmp.lt.s32.totalorder (%p43_p3), %s150_s29, 8  ;;  %s156_s4 = sadd.s32 (%p43_p3), %s975_s16, %s749_s30 }
  0x14   : > { %s730_s6 = sshll.u32 (%p43_p3), %s156_s4, 2  ;;  %s1104_s10 = scalar_lea.vmem (%p43_p3), [#allocation3], %s725_s28  }
  0x15   : > { %s1303_s29 = smov (!%p151_p7, %s150_s29), 8  ;;  %s1102_s9 = scalar_lea.vmem %s1280_s0, %s730_s6  }
  0x16   : > { %s727_s5 = sshll.u32 %s1303_s29, 2 }
  0x17   : > { %p731_p8 = scmp.eq.s32.totalorder %s727_s5, 0 }
  0x18   : > { %s1107_s11 = sshrl.u32 (!%p731_p8), %s1303_s29, 3 }
  0x19   : > { %161 = sbr.rel (%p731_p8) target bundleno = 63 (0x3f), region = 32  ;;  %p732_p9 = scmp.le.s32.totalorder (!%p731_p8), %s1107_s11, 0 }
  0x1e   : > { %667 = sbr.rel (%p732_p9) target bundleno = 46 (0x2e), region = 129  ;;  %s1284_s21 = smov (!%p732_p9), %s1104_s10 }
  0x1f   : > { %s1285_s22 = smov (!%p732_p9), %s1102_s9  ;;  %s1116_s23 = smov (!%p732_p9), 0  }
  0x20   : > { %s1118_s24 = smov (!%p732_p9), 0  }
  0x23 LB: >> { %v178_v0 = vld [vmem:[%s991_s22] sm:$0xf]  ;;  %v180_v1 = vld [vmem:[%s991_s22 + $0x10] sm:$0xf]  ;;  %s194_s26 = sadd.s32 1, %s995_s23  ;;  %s172_s24 = sadd.s32 1, %s999_s24   ;;  %s999_s24 = sphi %s1118_s24, %s172_s24   ;;  %s995_s23 = sphi %s1116_s23, %s1287_s23   ;;  %s991_s22 = sphi %s1285_s22, %s199_s22   ;;  %s987_s21 = sphi %s1284_s21, %s1286_s21  }
  0x24   : >> { %v182_v2 = vld [vmem:[%s991_s22 + $0x20] sm:$0xf]  ;;  %179 = vst [vmem:[%s987_s21] sm:$0xf] %v178_v0  ;;  %v184_v3 = vld [vmem:[%s991_s22 + $0x30] sm:$0xf]  ;;  %p195_p10 = scmp.ge.s32.totalorder %s194_s26, %s1107_s11  ;;  %p171_p11 = scmp.ge.s32.totalorder %s172_s24, %s1107_s11 }
  0x25   : >> { %181 = vst [vmem:[%s987_s21 + $0x4] sm:$0xf] %v180_v1  ;;  %v186_v4 = vld [vmem:[%s991_s22 + $0x40] sm:$0xf]  ;;  %v188_v5 = vld [vmem:[%s991_s22 + $0x50] sm:$0xf] }
  0x26   : >> { %183 = vst [vmem:[%s987_s21 + $0x8] sm:$0xf] %v182_v2  ;;  %v190_v6 = vld [vmem:[%s991_s22 + $0x60] sm:$0xf]  ;;  %s1305_s26 = smov (%p195_p10, %s194_s26), 0 }
  0x27   : >> { %185 = vst [vmem:[%s987_s21 + $0xc] sm:$0xf] %v184_v3  ;;  %v192_v7 = vld [vmem:[%s991_s22 + $0x70] sm:$0xf]  ;;  %s733_s27 = sshll.u32 %s1305_s26, 7  ;;  %s734_s28 = sshll.u32 %s1305_s26, 5 }
  0x28   : >> { %187 = vst [vmem:[%s987_s21 + $0x10] sm:$0xf] %v186_v4  ;;  %s199_s22 = scalar_lea.vmem %s1102_s9, %s733_s27   ;;  %s200_s30 = scalar_lea.vmem %s1104_s10, %s734_s28 [#allocation3]  }
  0x29   : >> { %189 = vst [vmem:[%s987_s21 + $0x14] sm:$0xf] %v188_v5  ;;  %s1287_s23 = smov %s1305_s26  ;;  %174 = sbr.rel (!%p171_p11) target bundleno = 35 (0x23), region = 135 }
  0x2a   : >> { %191 = vst [vmem:[%s987_s21 + $0x18] sm:$0xf] %v190_v6 }
  0x2b   : >> { %193 = vst [vmem:[%s987_s21 + $0x1c] sm:$0xf] %v192_v7  ;;  %s1286_s21 = smov %s200_s30 }
  0x2e PF: > { %s1140_s4 = sand.u32 7, %s1303_s29   ;;  %s750_s5 = sshll.u32 %s1107_s11, 7 }
  0x2f   : > { %s1144_s6 = scalar_lea.vmem %s1102_s9, %s750_s5   ;;  %s751_s7 = sshll.u32 %s1107_s11, 5 }
  0x30   : > { %s207_s8 = scalar_lea.vmem %s1104_s10, %s751_s7 [#allocation3]   ;;  %p738_p12 = scmp.le.s32.totalorder %s1140_s4, 0 }
  0x31   : > { %s1001_s26 = smov (!%p738_p12), %s207_s8   ;;  %s1005_s24 = smov (!%p738_p12), %s1144_s6  }
  0x32   : > { %681 = sbr.rel (%p738_p12) target bundleno = 63 (0x3f), region = 140  ;;  %s1009_s27 = smov (!%p738_p12), 0  }
  0x33   : > { %s1013_s21 = smov (!%p738_p12), 0  }
  0x37 LB: >> { %v217_v8 = vld [vmem:[%s1007_s24] sm:$0xf]  ;;  %s219_s29 = sadd.s32 1, %s1011_s27  ;;  %s211_s21 = sadd.s32 1, %s1015_s21   ;;  %s1015_s21 = sphi %s1013_s21, %s211_s21   ;;  %s1011_s27 = sphi %s1009_s27, %s1010_s27   ;;  %s1007_s24 = sphi %s1005_s24, %s224_s24   ;;  %s1003_s26 = sphi %s1001_s26, %s225_s26  }
  0x38   : >> { %218 = vst [vmem:[%s1003_s26] sm:$0xf] %v217_v8  ;;  %p220_p13 = scmp.ge.s32.totalorder %s219_s29, %s1140_s4  ;;  %p210_p0 = scmp.ge.s32.totalorder %s211_s21, %s1140_s4 }
  0x3a   : >> { %s1307_s29 = smov (%p220_p13, %s219_s29), 0  ;;  %213 = sbr.rel (!%p210_p0) target bundleno = 55 (0x37), region = 146 }
  0x3b   : >> { %s739_s9 = sshll.u32 %s1307_s29, 4  ;;  %s740_s10 = sshll.u32 %s1307_s29, 2 }
  0x3c   : >> { %s224_s24 = scalar_lea.vmem %s1144_s6, %s739_s9   ;;  %s225_s26 = scalar_lea.vmem %s207_s8, %s740_s10 [#allocation3]  }
  0x3d   : >> { %s1010_s27 = smov %s1307_s29  }
  0x3f PF: > { %p741_p1 = scmp.ge.s32.totalorder %s983_s18, 1  ;;  %p290_p2 = scmp.lt.s32.totalorder %s983_s18, 9 }
  0x41   : > { %p291_p3 = pnand %p741_p1, %p290_p2 }
  0x42   : > { %s297_s11 = sand.u32 (!%p291_p3), 1, %s959_s12   ;;  %p324_p4 = scmp.lt.s32.totalorder (!%p291_p3), %s971_s15, 1 }
  0x43   : > { %294 = sbr.rel (%p291_p3) target bundleno = 543 (0x21f), region = 76  ;;  %s742_s22 = sshll.u32 (!%p291_p3), %s297_s11, 5 }
  0x44   : > { %s1163_s5 = scalar_lea.vmem (!%p291_p3), [#allocation3], %s742_s22  ;;  %p744_p5 = scmp.ne.s32.totalorder (!%p291_p3), %s967_s14, 0 }
  0x48   : > { %s1309_s15 = smov (!%p324_p4, %s971_s15), 1  ;;  %332 = sbr.rel (%p744_p5) target bundleno = 79 (0x4f), region = 84 }
  0x49   : > { %s743_s23 = sshll.u32 %s1309_s15, 3 }
  0x4a   : > { %s1161_s4 = scalar_lea.vmem %s1283_s3, %s743_s23 }
  0x4d   : > { %v1017_v9 = vmov 0.0  }
  0x4e   : > { %333 = vst [vmem:[#allocation2] sm:$0xff] %v1017_v9 }
  0x4f PF: > { %p745_p6 = scmp.eq.s32.totalorder %s967_s14, 3 }
  0x51   : > { %337 = sbr.rel (%p745_p6) target bundleno = 111 (0x6f), region = 88 }
  0x56   : > { %v753_v10 = vld [vmem:[%s1163_s5] sm:$0xff]   ;;  %v768_v11 = vld [vmem:[%s1163_s5 + $0x8] sm:$0xff]   ;;  %v769_v12 = vld [vmem:[%s1163_s5 + $0x10] sm:$0xff]   ;;  %vm411_vm0 = vcmask 1041409   ;;  %vm413_vm1 = vcmask 1042434   ;;  %vm415_vm2 = vcmask 1043459  }
  0x57   : > { %v754_v13 = vunpack.c.l.bf16 %v753_v10  ;;  %v755_v14 = vunpack.c.h.bf16 %v753_v10  ;;  %v758_v15 = vunpack.c.l.bf16 %v768_v11  ;;  %v759_v16 = vunpack.c.h.bf16 %v768_v11  ;;  %v770_v17 = vld [vmem:[%s1163_s5 + $0x18] sm:$0xff]  }
  0x58   : > { %v762_v18 = vunpack.c.l.bf16 %v769_v12  ;;  %v763_v19 = vunpack.c.h.bf16 %v769_v12  ;;  %v766_v20 = vunpack.c.l.bf16 %v770_v17  ;;  %v767_v21 = vunpack.c.h.bf16 %v770_v17  ;;  %v346_v10 = vld [vmem:[#allocation2] sm:$0xff] }
  0x59   : > { %v355_v22 = vrot.slane %v754_v13, 4  ;;  %v361_v23 = vrot.slane %v755_v14, 4  ;;  %v367_v24 = vrot.slane %v758_v15, 4  ;;  %v373_v25 = vrot.slane %v759_v16, 4 }
  0x5a   : > { %v379_v26 = vrot.slane %v762_v18, 4  ;;  %v385_v27 = vrot.slane %v763_v19, 4  ;;  %v391_v28 = vrot.slane %v766_v20, 4  ;;  %v397_v29 = vrot.slane %v767_v21, 4 }
  0x5b   : > { %v356_v30 = vadd.f32 %v754_v13, %v355_v22  ;;  %v362_v31 = vadd.f32 %v755_v14, %v361_v23  ;;  %v368_v32 = vadd.f32 %v758_v15, %v367_v24  ;;  %v374_v33 = vadd.f32 %v759_v16, %v373_v25 }
  0x5c   : > { %v380_v34 = vadd.f32 %v762_v18, %v379_v26  ;;  %v386_v35 = vadd.f32 %v763_v19, %v385_v27  ;;  %v392_v36 = vadd.f32 %v766_v20, %v391_v28  ;;  %v398_v37 = vadd.f32 %v767_v21, %v397_v29 }
  0x5d   : > { %v357_v38 = vrot.slane %v356_v30, 2  ;;  %v363_v39 = vrot.slane %v362_v31, 2  ;;  %v369_v40 = vrot.slane %v368_v32, 2  ;;  %v375_v41 = vrot.slane %v374_v33, 2 }
  0x5e   : > { %v381_v42 = vrot.slane %v380_v34, 2  ;;  %v387_v43 = vrot.slane %v386_v35, 2  ;;  %v393_v44 = vrot.slane %v392_v36, 2  ;;  %v399_v45 = vrot.slane %v398_v37, 2 }
  0x5f   : > { %v358_v46 = vadd.f32 %v357_v38, %v356_v30  ;;  %v364_v47 = vadd.f32 %v363_v39, %v362_v31  ;;  %v370_v48 = vadd.f32 %v369_v40, %v368_v32  ;;  %v376_v49 = vadd.f32 %v375_v41, %v374_v33 }
  0x60   : > { %v382_v50 = vadd.f32 %v381_v42, %v380_v34  ;;  %v388_v51 = vadd.f32 %v387_v43, %v386_v35  ;;  %v394_v52 = vadd.f32 %v393_v44, %v392_v36  ;;  %v400_v53 = vadd.f32 %v399_v45, %v398_v37 }
  0x61   : > { %v359_v54 = vrot.slane %v358_v46, 1  ;;  %v365_v55 = vrot.slane %v364_v47, 1  ;;  %v371_v56 = vrot.slane %v370_v48, 1  ;;  %v377_v57 = vrot.slane %v376_v49, 1 }
  0x62   : > { %v383_v58 = vrot.slane %v382_v50, 1  ;;  %v389_v59 = vrot.slane %v388_v51, 1  ;;  %v395_v60 = vrot.slane %v394_v52, 1  ;;  %v401_v61 = vrot.slane %v400_v53, 1 }
  0x63   : > { %v360_v62 = vadd.f32 %v359_v54, %v358_v46  ;;  %v366_v63 = vadd.f32 %v365_v55, %v364_v47  ;;  %v372_v0 = vadd.f32 %v371_v56, %v370_v48  ;;  %v378_v1 = vadd.f32 %v377_v57, %v376_v49 }
  0x64   : > { %v384_v2 = vadd.f32 %v383_v58, %v382_v50  ;;  %v390_v3 = vadd.f32 %v389_v59, %v388_v51  ;;  %vm417_vm3 = vcmask 1044484   ;;  %v396_v5 = vadd.f32 %v395_v60, %v394_v52 }
  0x65   : > { %v412_v4 = vsel %vm411_vm0, %v366_v63, %v360_v62  ;;  %vm419_vm4 = vcmask 1045509   ;;  %v402_v7 = vadd.f32 %v401_v61, %v400_v53  ;;  %vm421_vm5 = vcmask 1046534  }
  0x66   : > { %v414_v6 = vsel %vm413_vm1, %v372_v0, %v412_v4  ;;  %vm423_vm6 = vcmask 1047559  }
  0x67   : > { %v416_v8 = vsel %vm415_vm2, %v378_v1, %v414_v6 }
  0x68   : > { %v418_v9 = vsel %vm417_vm3, %v384_v2, %v416_v8 }
  0x69   : > { %v420_v11 = vsel %vm419_vm4, %v390_v3, %v418_v9 }
  0x6a   : > { %v422_v12 = vsel %vm421_vm5, %v396_v5, %v420_v11 }
  0x6b   : > { %v424_v13 = vsel %vm423_vm6, %v402_v7, %v422_v12 }
  0x6c   : > { %v426_v14 = vadd.f32 %v424_v13, %v346_v10 }
  0x6e   : > { %427 = vst [vmem:[#allocation2] sm:$0xff] %v426_v14 }
  0x6f PF: > { %p746_p7 = scmp.ne.s32.totalorder %s967_s14, 3 }
  0x71   : > { %431 = sbr.rel (%p746_p7) target bundleno = 543 (0x21f), region = 92 }
  0x76   : > { %v550_v15 = vld [vmem:[%s1281_s1 + $0x78] sm:$0xff]  ;;  %v549_v16 = vld [vmem:[%s1281_s1 + $0x70] sm:$0xff]  ;;  %v440_v17 = vlaneseq  ;;  %v548_v18 = vld [vmem:[%s1281_s1 + $0x68] sm:$0xff]  ;;  %vm517_vm9 = vcmask 1041409   ;;  %vm519_vm10 = vcmask 1042434   ;;  %vm521_vm11 = vcmask 1043459  }
  0x77   : > { %555 = vmatpush.msra.mxu0 %v550_v15  ;;  %v547_v20 = vld [vmem:[%s1281_s1 + $0x60] sm:$0xff]  ;;  %v546_v21 = vld [vmem:[%s1281_s1 + $0x58] sm:$0xff]  ;;  %v432_v22 = vld [vmem:[%s1163_s5] sm:$0xf]  ;;  %vm523_vm12 = vcmask 1044484   ;;  %vm525_vm13 = vcmask 1045509  }
  0x78   : > { %v441_v19 = vshrl.u32 %v440_v17, 7  ;;  %v433_v23 = vld [vmem:[%s1163_s5 + $0x4] sm:$0xf]  ;;  %v434_v24 = vld [vmem:[%s1163_s5 + $0x8] sm:$0xf]  ;;  %v543_v45 = vld [vmem:[%s1281_s1 + $0x40] sm:$0xff] }
  0x79   : > { %556 = vmatpush.msra.mxu0 %v549_v16  ;;  %v435_v25 = vld [vmem:[%s1163_s5 + $0xc] sm:$0xf]  ;;  %v436_v26 = vld [vmem:[%s1163_s5 + $0x10] sm:$0xf]  ;;  %v437_v27 = vld [vmem:[%s1163_s5 + $0x14] sm:$0xf] }
  0x7a   : > { %vm442_vm7 = vcmp.lt.s32.totalorder %v441_v19, 1  ;;  %v438_v28 = vld [vmem:[%s1163_s5 + $0x18] sm:$0xf]  ;;  %v439_v29 = vld [vmem:[%s1163_s5 + $0x1c] sm:$0xf]  ;;  %v545_v30 = vld [vmem:[%s1281_s1 + $0x50] sm:$0xff] }
  0x7b   : > { %557 = vmatpush.msra.mxu0 %v548_v18  ;;  %vm1200_vm8 = vmpackc.low %vm442_vm7, %vm442_vm7  ;;  %v544_v36 = vld [vmem:[%s1281_s1 + $0x48] sm:$0xff]  ;;  %v542_v54 = vld [vmem:[%s1281_s1 + $0x38] sm:$0xff]  ;;  %vm527_vm14 = vcmask 1046534   ;;  %vm529_vm15 = vcmask 1047559   ;;  %vm575_vm0 = vcmask 15360  }
  0x7c   : > { %v444_v32 = vsel %vm1200_vm8, %v432_v22, 0  ;;  %v445_v33 = vsel %vm1200_vm8, %v433_v23, 0  ;;  %v446_v34 = vsel %vm1200_vm8, %v434_v24, 0  ;;  %v447_v35 = vsel %vm1200_vm8, %v435_v25, 0  ;;  %v541_v63 = vld [vmem:[%s1281_s1 + $0x30] sm:$0xff]  ;;  %v540_v8 = vld [vmem:[%s1281_s1 + $0x28] sm:$0xff] }
  0x7d   : > { %558 = vmatpush.msra.mxu0 %v547_v20  ;;  %v448_v37 = vsel %vm1200_vm8, %v436_v26, 0  ;;  %v449_v38 = vsel %vm1200_vm8, %v437_v27, 0  ;;  %v450_v39 = vsel %vm1200_vm8, %v438_v28, 0  ;;  %v451_v40 = vsel %vm1200_vm8, %v439_v29, 0  ;;  %v539_v17 = vld [vmem:[%s1281_s1 + $0x20] sm:$0xff]  ;;  %v538_v26 = vld [vmem:[%s1281_s1 + $0x18] sm:$0xff] }
  0x7e   : > { %v453_v41 = vunpack.c.l.bf16 %v444_v32  ;;  %v454_v42 = vunpack.c.l.bf16 %v445_v33  ;;  %v455_v43 = vunpack.c.l.bf16 %v446_v34  ;;  %v456_v44 = vunpack.c.l.bf16 %v447_v35  ;;  %v537_v35 = vld [vmem:[%s1281_s1 + $0x10] sm:$0xff] }
  0x7f   : > { %559 = vmatpush.msra.mxu0 %v546_v21  ;;  %v457_v46 = vunpack.c.l.bf16 %v448_v37  ;;  %v458_v47 = vunpack.c.l.bf16 %v449_v38  ;;  %v459_v48 = vunpack.c.l.bf16 %v450_v39  ;;  %v460_v49 = vunpack.c.l.bf16 %v451_v40  ;;  %v536_v39 = vld [vmem:[%s1281_s1 + $0x8] sm:$0xff] }
  0x80   : > { %v461_v50 = vrot.slane %v453_v41, 4  ;;  %v467_v51 = vrot.slane %v454_v42, 4  ;;  %v473_v52 = vrot.slane %v455_v43, 4  ;;  %v479_v53 = vrot.slane %v456_v44, 4 }
  0x81   : > { %560 = vmatpush.msra.mxu0 %v545_v30  ;;  %v485_v55 = vrot.slane %v457_v46, 4  ;;  %v491_v56 = vrot.slane %v458_v47, 4  ;;  %v497_v57 = vrot.slane %v459_v48, 4  ;;  %v503_v58 = vrot.slane %v460_v49, 4 }
  0x82   : > { %v462_v59 = vadd.f32 %v461_v50, %v453_v41  ;;  %v468_v60 = vadd.f32 %v467_v51, %v454_v42  ;;  %v474_v61 = vadd.f32 %v473_v52, %v455_v43  ;;  %v480_v62 = vadd.f32 %v479_v53, %v456_v44  ;;  %v535_v44 = vld [vmem:[%s1281_s1] sm:$0xff] }
  0x83   : > { %561 = vmatpush.msra.mxu0 %v544_v36  ;;  %v486_v0 = vadd.f32 %v485_v55, %v457_v46  ;;  %v492_v1 = vadd.f32 %v491_v56, %v458_v47  ;;  %v498_v2 = vadd.f32 %v497_v57, %v459_v48  ;;  %v504_v3 = vadd.f32 %v503_v58, %v460_v49  ;;  %v452_v46 = vld [vmem:[#allocation2] sm:$0xff] }
  0x84   : > { %v463_v4 = vrot.slane %v462_v59, 2  ;;  %v469_v5 = vrot.slane %v468_v60, 2  ;;  %v475_v6 = vrot.slane %v474_v61, 2  ;;  %v481_v7 = vrot.slane %v480_v62, 2  ;;  %v892_v51 = vld [vmem:[%s1282_s2] ss:$0 sm:$0xff] }
  0x85   : > { %562 = vmatpush.msra.mxu0 %v543_v45  ;;  %v487_v9 = vrot.slane %v486_v0, 2  ;;  %v493_v10 = vrot.slane %v492_v1, 2  ;;  %v499_v11 = vrot.slane %v498_v2, 2  ;;  %v505_v12 = vrot.slane %v504_v3, 2 }
  0x86   : > { %v464_v13 = vadd.f32 %v463_v4, %v462_v59  ;;  %v470_v14 = vadd.f32 %v469_v5, %v468_v60  ;;  %v476_v15 = vadd.f32 %v475_v6, %v474_v61  ;;  %v482_v16 = vadd.f32 %v481_v7, %v480_v62 }
  0x87   : > { %563 = vmatpush.msra.mxu0 %v542_v54  ;;  %v488_v18 = vadd.f32 %v487_v9, %v486_v0  ;;  %v494_v19 = vadd.f32 %v493_v10, %v492_v1  ;;  %v500_v20 = vadd.f32 %v499_v11, %v498_v2  ;;  %v506_v21 = vadd.f32 %v505_v12, %v504_v3 }
  0x88   : > { %v465_v22 = vrot.slane %v464_v13, 1  ;;  %v471_v23 = vrot.slane %v470_v14, 1  ;;  %v477_v24 = vrot.slane %v476_v15, 1  ;;  %v483_v25 = vrot.slane %v482_v16, 1 }
  0x89   : > { %564 = vmatpush.msra.mxu0 %v541_v63  ;;  %v489_v27 = vrot.slane %v488_v18, 1  ;;  %v495_v28 = vrot.slane %v494_v19, 1  ;;  %v501_v29 = vrot.slane %v500_v20, 1  ;;  %v507_v30 = vrot.slane %v506_v21, 1 }
  0x8a   : > { %v466_v31 = vadd.f32 %v465_v22, %v464_v13  ;;  %v472_v32 = vadd.f32 %v471_v23, %v470_v14  ;;  %v478_v33 = vadd.f32 %v477_v24, %v476_v15  ;;  %v484_v34 = vadd.f32 %v483_v25, %v482_v16 }
  0x8b   : > { %565 = vmatpush.msra.mxu0 %v540_v8  ;;  %v490_v36 = vadd.f32 %v489_v27, %v488_v18  ;;  %v496_v37 = vadd.f32 %v495_v28, %v494_v19  ;;  %v502_v40 = vadd.f32 %v501_v29, %v500_v20  ;;  %v508_v42 = vadd.f32 %v507_v30, %v506_v21 }
  0x8c   : > { %v518_v38 = vsel %vm517_vm9, %v472_v32, %v466_v31 }
  0x8d   : > { %566 = vmatpush.msra.mxu0 %v539_v17  ;;  %v520_v41 = vsel %vm519_vm10, %v478_v33, %v518_v38 }
  0x8e   : > { %v522_v43 = vsel %vm521_vm11, %v484_v34, %v520_v41 }
  0x8f   : > { %567 = vmatpush.msra.mxu0 %v538_v26  ;;  %v524_v45 = vsel %vm523_vm12, %v490_v36, %v522_v43 }
  0x90   : > { %v526_v47 = vsel %vm525_vm13, %v496_v37, %v524_v45 }
  0x91   : > { %568 = vmatpush.msra.mxu0 %v537_v35  ;;  %v528_v48 = vsel %vm527_vm14, %v502_v40, %v526_v47 }
  0x92   : > { %v530_v49 = vsel %vm529_vm15, %v508_v42, %v528_v48 }
  0x93   : > { %569 = vmatpush.msra.mxu0 %v536_v39  ;;  %v532_v50 = vadd.f32 %v530_v49, %v452_v46 }
  0x95   : > { %570 = vmatpush.msra.mxu0 %v535_v44  ;;  %533 = vst [vmem:[#allocation2] sm:$0xff] %v532_v50 }
  0x96   : > { %571 = vmatmul.f32.vlgmr.msra.gmra.mxu0 %v532_v50 }
 0x113   : > { %v572_v52 = vpop.f32.mrf.mxu0 }
 0x114   : > { %v573_v53 = vadd.f32 %v892_v51, %v572_v52 }
 0x116   : > { %v576_v54 = vsel %vm575_vm0, %v573_v53, -inf }
 0x117   : > { %577 = vmax.xlane.f32.xlu0 %v576_v54 }
 0x18a   : > { %v578_v55 = vpop.xlane.xlu0 %577 }
 0x18b   : > { %v579_v56 = vsub.f32 %v573_v53, %v578_v55 }
 0x18d   : > { %v580_v57 = vmul.f32 1.442695, %v579_v56 }
 0x18f   : > { %893 = vpow2.f32 %v580_v57 }
 0x195   : > { %v894_v58 = vpop.eup %893 }
 0x196   : > { %v582_v59 = vsel %vm575_vm0, %v894_v58, 0.0 }
 0x197   : > { %583 = vadd.xlane.f32.xlu0 %v582_v59 }
 0x20a   : > { %v584_v60 = vpop.xlane.xlu0 %583 }
 0x20b   : > { %895 = vrcp.f32 %v584_v60  ;;  %v596_v0 = vand.u32 2147483648, %v584_v60  ;;  %v594_v2 = vand.u32 2147483647, %v584_v60  ;;  %vm590_vm2 = vweird.f32 %v584_v60 }
 0x20d   : > { %v597_v4 = vor.u32 1.1754944e-38, %v596_v0  ;;  %vm595_vm4 = vcmp.eq.f32.partialorder %v594_v2, 8.507059e+37 }
 0x211   : > { %v896_v61 = vpop.eup %895 }
 0x212   : > { %v586_v62 = vmul.f32 %v896_v61, %v584_v60  ;;  %vm591_vm1 = vweird.f32 %v896_v61 }
 0x213   : > { %vm592_vm3 = vmor %vm590_vm2, %vm591_vm1 }
 0x214   : > { %v587_v63 = vsub.f32 1.0, %v586_v62 }
 0x216   : > { %v588_v1 = vmul.f32 %v896_v61, %v587_v63 }
 0x218   : > { %v589_v3 = vadd.f32 %v896_v61, %v588_v1 }
 0x21a   : > { %v593_v5 = vsel %vm592_vm3, %v896_v61, %v589_v3 }
 0x21b   : > { %v598_v6 = vsel %vm595_vm4, %v597_v4, %v593_v5 }
 0x21c   : > { %v599_v7 = vmul.f32 %v894_v58, %v598_v6 }
 0x21e   : > { %600 = vst.msk [vmem:[%s1161_s4] sm:$0xff] %vm575_vm0, %v599_v7 }
 0x21f PF: > { %s13_s18 = sadd.s32 1, %s983_s18   ;;  %s1290_s12 = smov %s963_s13 }
 0x220   : > { %p10_p8 = scmp.ge.s32.totalorder %s13_s18, 10   ;;  %s1291_s13 = smov %s1089_s25 }
 0x221   : > { %s1292_s14 = smov %s975_s16  ;;  %s1293_s15 = smov %s979_s17 }
 0x222   : > { %s1294_s16 = smov %s1297_s19  ;;  %s1295_s17 = smov %s1301_s20 }
 0x223   :  { %12 = sbr.rel (!%p10_p8) target bundleno = 4 (0x4), region = 157 }

</bundles_post_ra>
